<compile_context>
chip_gen: v7x
topology: tpu7x:2x2x1
jax: 0.10.0
libtpu: 0.0.40
codegen_flags: <defaults>
</compile_context>

<pallas_src>
import functools

import jax
import jax.numpy as jnp
from jax.experimental import pallas as pl
from jax.experimental.pallas import tpu as pltpu


def attention_kernel(x_ref, gamma_ref, beta_ref, wqkv_ref, wout_ref, o_ref, *,
                     heads, dim_head, eps):
    block_b, N, D = x_ref.shape
    inner = heads * dim_head
    R = block_b * N

    # ---- LayerNorm on flattened (R, D) rows; f32 math, biased variance ----
    x = x_ref[...].reshape(R, D).astype(jnp.float32)
    mean = jnp.mean(x, axis=-1, keepdims=True)
    xc = x - mean
    var = jnp.mean(xc * xc, axis=-1, keepdims=True)
    xn = (xc * jax.lax.rsqrt(var + eps)) * gamma_ref[...] + beta_ref[...]
    xn = xn.astype(jnp.bfloat16)            # bf16 MXU operands, f32 accumulation

    # ---- fused, lane-dense QKV projection (one depth-D MXU matmul) ----
    # Softmax scale is already folded into the Q columns by the wrapper; single downcast.
    qkv = jnp.dot(xn, wqkv_ref[...], preferred_element_type=jnp.float32)
    qkv = qkv.astype(jnp.bfloat16)                                   # (R, 3*inner)

    # ---- 'b n (h d) -> (h b) n d' via lane slices + sublane concat (no transpose op).
    # Batch ordering (h, b) is arbitrary; it is inverted consistently below.
    def split_heads(cols):                                           # cols: (R, inner)
        parts = [cols[:, h * dim_head:(h + 1) * dim_head].reshape(block_b, N, dim_head)
                 for h in range(heads)]
        return jnp.concatenate(parts, axis=0)                        # (heads*block_b, N, dh)

    q = split_heads(qkv[:, 0 * inner:1 * inner])
    k = split_heads(qkv[:, 1 * inner:2 * inner])
    v = split_heads(qkv[:, 2 * inner:3 * inner])

    # ---- attention, batched over the fused (heads*block_b) leading dim ----
    s = jnp.einsum('bqd,bkd->bqk', q, k,
                   preferred_element_type=jnp.float32)               # (HB, N, N) f32
    s = s - jnp.max(s, axis=-1, keepdims=True)
    p = jnp.exp(s)
    # approx reciprocal (EUP slot): softmax rows sum to 1 only to ~1e-3 relative.
    attn = p * pl.reciprocal(jnp.sum(p, axis=-1, keepdims=True), approx=True)
    o = jnp.einsum('bqk,bkd->bqd', attn.astype(jnp.bfloat16), v,
                   preferred_element_type=jnp.float32)               # (HB, N, dh) f32

    # ---- '(h b) n d -> (b n) (h d)' then fused depth-`inner` output projection ----
    o = o.astype(jnp.bfloat16).reshape(heads, R, dim_head)
    out_inner = jnp.concatenate([o[h] for h in range(heads)], axis=-1)   # (R, inner)
    y = jnp.dot(out_inner, wout_ref[...], preferred_element_type=jnp.float32)  # (R, D)

    # ---- single slab store; lane-dense (block_b, N*D) layout when requested ----
    if o_ref.ndim == 2:
        o_ref[...] = y.reshape(block_b, N * D).astype(o_ref.dtype)
    else:
        o_ref[...] = y.reshape(block_b, N, D).astype(o_ref.dtype)


def _default_vmem_limit():
    """Generation-aware scoped-VMEM request: ~75% of physical per-core VMEM
    (~48 MiB on v7x's 64 MiB, ~96 MiB on v5e/v6e's 128 MiB). Never request the
    full physical amount — double-buffered I/O blocks and compiler scratch need room."""
    try:
        cap = int(pltpu.get_tpu_info().vmem_capacity_bytes)
    except Exception:
        cap = 64 * 1024 * 1024            # conservative fallback, safe on every generation
    return max(32 * 1024 * 1024, min((cap * 3) // 4, 100 * 1024 * 1024))


def _estimate_step_bytes(block_b, N, D, heads, dim_head, x_itemsize):
    """Rough per-grid-step VMEM footprint: I/O blocks, weights, main temporaries."""
    R = block_b * N
    inner = heads * dim_head
    hb = heads * block_b
    io = 2 * block_b * N * D * x_itemsize * 2            # double-buffered x + out blocks
    w = (D * 3 * inner + inner * D) * 2 * 2              # bf16 weights (worst case 2 buffers)
    proj = R * D * (4 + 2) + R * 3 * inner * (4 + 2)     # LN rows + fused qkv (f32 + bf16)
    qkv_hb = 3 * hb * N * dim_head * 2                   # head-batched q/k/v (bf16)
    scores = 3 * hb * N * N * 4                          # s / p / attn (f32)
    outp = hb * N * dim_head * (4 + 2) + R * inner * 2 + R * D * 4
    return io + w + proj + qkv_hb + scores + outp


def _choose_block_b(B, N, D, heads, dim_head, x_itemsize, budget_bytes):
    """Largest divisor of B whose estimated footprint fits the VMEM budget.
    Bigger tiles amortize the ~0.35us/step pipeline overhead; single-TC chips gain
    nothing from extra steps and v7x megacore still splits the grid when steps > 1."""
    best = 1
    for d in range(1, B + 1):
        if B % d == 0 and _estimate_step_bytes(d, N, D, heads, dim_head, x_itemsize) <= budget_bytes:
            best = d
    return best


def _build_call(x_dtype, B, N, D, heads, dim_head, block_b, eps, grid, vmem_limit,
                *, single_buffer_consts, flat_out):
    inner = heads * dim_head
    kernel = functools.partial(attention_kernel, heads=heads, dim_head=dim_head, eps=eps)

    const_kwargs = {}
    if single_buffer_consts:
        # Constant index maps are fetched exactly once -> one buffer is enough.
        # Saves a full weight copy of VMEM (matters inside v7x's 64 MiB budget).
        const_kwargs = dict(pipeline_mode=pl.Buffered(1))

    x_spec = pl.BlockSpec((block_b, N, D), lambda i: (i, 0, 0))
    gamma_spec = pl.BlockSpec((1, D), lambda i: (0, 0), **const_kwargs)
    beta_spec = pl.BlockSpec((1, D), lambda i: (0, 0), **const_kwargs)
    wqkv_spec = pl.BlockSpec((D, 3 * inner), lambda i: (0, 0), **const_kwargs)
    wout_spec = pl.BlockSpec((inner, D), lambda i: (0, 0), **const_kwargs)

    if flat_out:
        out_shape = jax.ShapeDtypeStruct((B, N * D), x_dtype)
        out_spec = pl.BlockSpec((block_b, N * D), lambda i: (i, 0))
    else:
        out_shape = jax.ShapeDtypeStruct((B, N, D), x_dtype)
        out_spec = pl.BlockSpec((block_b, N, D), lambda i: (i, 0, 0))

    return pl.pallas_call(
        kernel,
        out_shape=out_shape,
        grid_spec=pltpu.PrefetchScalarGridSpec(
            num_scalar_prefetch=0,
            grid=grid,
            in_specs=[x_spec, gamma_spec, beta_spec, wqkv_spec, wout_spec],
            out_specs=out_spec,
        ),
        compiler_params=pltpu.CompilerParams(
            dimension_semantics=("parallel",),
            vmem_limit_bytes=vmem_limit,
        ),
    )


# Probed once: Buffered(1) const blocks + lane-dense flat output (fallback if unsupported).
_FAST_PATH_OK = None


def attention_forward(x, gamma, beta, w_qkv, w_out, *, heads, dim_head,
                      block_b=None, eps=1e-5):
    global _FAST_PATH_OK
    B, N, D = x.shape
    inner = heads * dim_head
    assert w_qkv.shape == (D, 3 * inner) and w_out.shape == (inner, D)
    scale = float(dim_head) ** (-0.5)

    # ---- wrapper-side layout plumbing (free): fold softmax scale into the Q
    # columns of the fused QKV weight, ship bf16 weights, keep LN params f32.
    # TODO(synk): for repeated calls, pre-convert these once (or jit this wrapper)
    # instead of re-casting the weights on every invocation.
    w_qkv_f = jnp.concatenate([w_qkv[:, :inner] * scale, w_qkv[:, inner:]],
                              axis=1).astype(jnp.bfloat16)
    w_out_f = w_out.astype(jnp.bfloat16)
    gamma2 = gamma.reshape(1, D).astype(jnp.float32)
    beta2 = beta.reshape(1, D).astype(jnp.float32)

    vmem_limit = _default_vmem_limit()
    if block_b is None:
        block_b = _choose_block_b(B, N, D, heads, dim_head, x.dtype.itemsize,
                                  vmem_limit // 2)
    assert B % block_b == 0
    grid = (B // block_b,)

    # Lane-dense output packing only pays off when D is lane-sparse and the packed
    # block still satisfies the (8, 128) block-shape rule on its second-minor dim.
    flat_ok = (D % 128 != 0) and ((N * D) % 128 == 0) and (block_b == B or block_b % 8 == 0)

    attempts = [False] if _FAST_PATH_OK is False else [True, False]
    err = None
    for fast in attempts:
        try:
            call = _build_call(x.dtype, B, N, D, heads, dim_head, block_b, eps,
                               grid, vmem_limit,
                               single_buffer_consts=fast,
                               flat_out=flat_ok and fast)
            out = jax.block_until_ready(call(x, gamma2, beta2, w_qkv_f, w_out_f))
            _FAST_PATH_OK = fast
            return out.reshape(B, N, D) if (flat_ok and fast) else out
        except Exception as e:   # fall back for pallas versions w/o Buffered(1)/flat stores
            err = e
            _FAST_PATH_OK = False
    raise err


def attention_reference(x, gamma, beta, w_qkv, w_out, *, heads, dim_head):
    # Pure-JAX (f32) reference mirroring the PyTorch forward.
    B, N, D = x.shape
    inner = heads * dim_head
    scale = float(dim_head) ** (-0.5)
    mean = jnp.mean(x, axis=-1, keepdims=True)
    var = jnp.mean((x - mean) ** 2, axis=-1, keepdims=True)
    xn = (x - mean) / jnp.sqrt(var + 1e-5) * gamma + beta
    qkv = xn @ w_qkv
    q, k, v = jnp.split(qkv, 3, axis=-1)

    def split_heads(t):  # b n (h d) -> b h n d
        return t.reshape(B, N, heads, dim_head).transpose(0, 2, 1, 3)

    q, k, v = map(split_heads, (q, k, v))
    dots = jnp.einsum('bhnd,bhmd->bhnm', q, k) * scale
    attn = jax.nn.softmax(dots, axis=-1)
    out = jnp.einsum('bhnm,bhmd->bhnd', attn, v)
    out = out.transpose(0, 2, 1, 3).reshape(B, N, inner)
    return out @ w_out


if __name__ == "__main__":
    # Small shapes consistent with the module: dim=32, heads=4, dim_head=16.
    B, N, D = 2, 8, 32
    heads, dim_head = 4, 16
    inner = heads * dim_head

    key = jax.random.PRNGKey(0)
    kx, kq, ko = jax.random.split(key, 3)

    x = jax.random.normal(kx, (B, N, D), dtype=jnp.float32)
    gamma = jnp.ones((D,), dtype=jnp.float32)   # nn.LayerNorm defaults
    beta = jnp.zeros((D,), dtype=jnp.float32)
    w_qkv = jax.random.normal(kq, (D, 3 * inner), dtype=jnp.float32) * 0.05
    w_out = jax.random.normal(ko, (inner, D), dtype=jnp.float32) * 0.05

    out = attention_forward(x, gamma, beta, w_qkv, w_out,
                            heads=heads, dim_head=dim_head)
    out = jax.block_until_ready(out)

    ref = attention_reference(x, gamma, beta, w_qkv, w_out,
                              heads=heads, dim_head=dim_head)
    assert out.shape == (B, N, D)
    max_err = float(jnp.max(jnp.abs(out - ref)))
    # bf16 MXU operands + approximate reciprocal -> compare at bf16-level tolerance
    assert jnp.allclose(out, ref, atol=2e-2, rtol=2e-2), \
        f"mismatch vs reference (max abs err {max_err})"

    print("KERNEL_OK")
</pallas_src>

<mosaic_0001>
module attributes {stable_mosaic.version = 11 : i64} {
  func.func @attention_kernel(%arg0: i32, %arg1: memref<2x8x32xf32, #tpu.memory_space<vmem>>, %arg2: memref<1x32xf32, #tpu.memory_space<vmem>>, %arg3: memref<1x32xf32, #tpu.memory_space<vmem>>, %arg4: memref<32x192xbf16, #tpu.memory_space<vmem>>, %arg5: memref<64x32xbf16, #tpu.memory_space<vmem>>, %arg6: memref<2x256xf32, #tpu.memory_space<vmem>>) attributes {dimension_semantics = [#tpu.dimension_semantics<parallel>], iteration_bounds = array<i64: 1>, scalar_prefetch = 0 : i64, scratch_operands = 0 : i64, tpu.core_type = #tpu.core_type<tc>, window_params = [{transform_indices = @transform_0, window_bounds = array<i64: 2, 8, 32>}, {pipeline_mode = #tpu.pipeline_mode<synchronous>, transform_indices = @transform_1, window_bounds = array<i64: 1, 32>}, {pipeline_mode = #tpu.pipeline_mode<synchronous>, transform_indices = @transform_2, window_bounds = array<i64: 1, 32>}, {pipeline_mode = #tpu.pipeline_mode<synchronous>, transform_indices = @transform_3, window_bounds = array<i64: 32, 192>}, {pipeline_mode = #tpu.pipeline_mode<synchronous>, transform_indices = @transform_4, window_bounds = array<i64: 64, 32>}, {transform_indices = @transform_5, window_bounds = array<i64: 2, 256>}]} {
    %c0 = arith.constant 0 : index
    %c0_0 = arith.constant 0 : index
    %c0_1 = arith.constant 0 : index
    %0 = vector.load %arg1[%c0, %c0_0, %c0_1] : memref<2x8x32xf32, #tpu.memory_space<vmem>>, vector<2x8x32xf32>
    %1 = vector.shape_cast %0 : vector<2x8x32xf32> to vector<16x32xf32>
    %cst = arith.constant dense<0.000000e+00> : vector<16xf32>
    %2 = vector.multi_reduction <add>, %1, %cst [1] : vector<16x32xf32> to vector<16xf32>
    %3 = vector.shape_cast %2 : vector<16xf32> to vector<16x1xf32>
    %cst_2 = arith.constant 3.200000e+01 : f32
    %4 = vector.broadcast %cst_2 : f32 to vector<16x1xf32>
    %5 = arith.divf %3, %4 : vector<16x1xf32>
    %6 = vector.broadcast %5 : vector<16x1xf32> to vector<16x32xf32>
    %7 = arith.subf %1, %6 : vector<16x32xf32>
    %8 = arith.mulf %7, %7 : vector<16x32xf32>
    %cst_3 = arith.constant dense<0.000000e+00> : vector<16xf32>
    %9 = vector.multi_reduction <add>, %8, %cst_3 [1] : vector<16x32xf32> to vector<16xf32>
    %10 = vector.shape_cast %9 : vector<16xf32> to vector<16x1xf32>
    %cst_4 = arith.constant 3.200000e+01 : f32
    %11 = vector.broadcast %cst_4 : f32 to vector<16x1xf32>
    %12 = arith.divf %10, %11 : vector<16x1xf32>
    %cst_5 = arith.constant 9.99999974E-6 : f32
    %13 = vector.broadcast %cst_5 : f32 to vector<16x1xf32>
    %14 = arith.addf %12, %13 : vector<16x1xf32>
    %15 = math.rsqrt %14 : vector<16x1xf32>
    %16 = vector.broadcast %15 : vector<16x1xf32> to vector<16x32xf32>
    %17 = arith.mulf %7, %16 : vector<16x32xf32>
    %c0_6 = arith.constant 0 : index
    %c0_7 = arith.constant 0 : index
    %18 = vector.load %arg2[%c0_6, %c0_7] : memref<1x32xf32, #tpu.memory_space<vmem>>, vector<1x32xf32>
    %19 = vector.broadcast %18 : vector<1x32xf32> to vector<16x32xf32>
    %20 = arith.mulf %17, %19 : vector<16x32xf32>
    %c0_8 = arith.constant 0 : index
    %c0_9 = arith.constant 0 : index
    %21 = vector.load %arg3[%c0_8, %c0_9] : memref<1x32xf32, #tpu.memory_space<vmem>>, vector<1x32xf32>
    %22 = vector.broadcast %21 : vector<1x32xf32> to vector<16x32xf32>
    %23 = arith.addf %20, %22 : vector<16x32xf32>
    %24 = arith.truncf %23 : vector<16x32xf32> to vector<16x32xbf16>
    %c0_10 = arith.constant 0 : index
    %c0_11 = arith.constant 0 : index
    %25 = vector.load %arg4[%c0_10, %c0_11] : memref<32x192xbf16, #tpu.memory_space<vmem>>, vector<32x192xbf16>
    %cst_12 = arith.constant dense<0.000000e+00> : vector<16x192xf32>
    %26 = tpu.matmul %24, %25, %cst_12 {dimension_numbers = #tpu.dot_dimension_numbers<[1], [0], [0], [1], [0, 0, 1, 1], [], []>} : vector<16x32xbf16>, vector<32x192xbf16>, vector<16x192xf32> -> vector<16x192xf32>
    %27 = arith.truncf %26 : vector<16x192xf32> to vector<16x192xbf16>
    %28 = vector.extract_strided_slice %27 {offsets = [0, 0], sizes = [16, 64], strides = [1, 1]} : vector<16x192xbf16> to vector<16x64xbf16>
    %29 = vector.extract_strided_slice %28 {offsets = [0, 0], sizes = [16, 16], strides = [1, 1]} : vector<16x64xbf16> to vector<16x16xbf16>
    %30 = vector.shape_cast %29 : vector<16x16xbf16> to vector<2x8x16xbf16>
    %31 = vector.extract_strided_slice %28 {offsets = [0, 16], sizes = [16, 16], strides = [1, 1]} : vector<16x64xbf16> to vector<16x16xbf16>
    %32 = vector.shape_cast %31 : vector<16x16xbf16> to vector<2x8x16xbf16>
    %33 = vector.extract_strided_slice %28 {offsets = [0, 32], sizes = [16, 16], strides = [1, 1]} : vector<16x64xbf16> to vector<16x16xbf16>
    %34 = vector.shape_cast %33 : vector<16x16xbf16> to vector<2x8x16xbf16>
    %35 = vector.extract_strided_slice %28 {offsets = [0, 48], sizes = [16, 16], strides = [1, 1]} : vector<16x64xbf16> to vector<16x16xbf16>
    %36 = vector.shape_cast %35 : vector<16x16xbf16> to vector<2x8x16xbf16>
    %37 = tpu.concatenate %30, %32, %34, %36 in 0 : vector<2x8x16xbf16>, vector<2x8x16xbf16>, vector<2x8x16xbf16>, vector<2x8x16xbf16> -> vector<8x8x16xbf16>
    %38 = vector.extract_strided_slice %27 {offsets = [0, 64], sizes = [16, 64], strides = [1, 1]} : vector<16x192xbf16> to vector<16x64xbf16>
    %39 = vector.extract_strided_slice %38 {offsets = [0, 0], sizes = [16, 16], strides = [1, 1]} : vector<16x64xbf16> to vector<16x16xbf16>
    %40 = vector.shape_cast %39 : vector<16x16xbf16> to vector<2x8x16xbf16>
    %41 = vector.extract_strided_slice %38 {offsets = [0, 16], sizes = [16, 16], strides = [1, 1]} : vector<16x64xbf16> to vector<16x16xbf16>
    %42 = vector.shape_cast %41 : vector<16x16xbf16> to vector<2x8x16xbf16>
    %43 = vector.extract_strided_slice %38 {offsets = [0, 32], sizes = [16, 16], strides = [1, 1]} : vector<16x64xbf16> to vector<16x16xbf16>
    %44 = vector.shape_cast %43 : vector<16x16xbf16> to vector<2x8x16xbf16>
    %45 = vector.extract_strided_slice %38 {offsets = [0, 48], sizes = [16, 16], strides = [1, 1]} : vector<16x64xbf16> to vector<16x16xbf16>
    %46 = vector.shape_cast %45 : vector<16x16xbf16> to vector<2x8x16xbf16>
    %47 = tpu.concatenate %40, %42, %44, %46 in 0 : vector<2x8x16xbf16>, vector<2x8x16xbf16>, vector<2x8x16xbf16>, vector<2x8x16xbf16> -> vector<8x8x16xbf16>
    %48 = vector.extract_strided_slice %27 {offsets = [0, 128], sizes = [16, 64], strides = [1, 1]} : vector<16x192xbf16> to vector<16x64xbf16>
    %49 = vector.extract_strided_slice %48 {offsets = [0, 0], sizes = [16, 16], strides = [1, 1]} : vector<16x64xbf16> to vector<16x16xbf16>
    %50 = vector.shape_cast %49 : vector<16x16xbf16> to vector<2x8x16xbf16>
    %51 = vector.extract_strided_slice %48 {offsets = [0, 16], sizes = [16, 16], strides = [1, 1]} : vector<16x64xbf16> to vector<16x16xbf16>
    %52 = vector.shape_cast %51 : vector<16x16xbf16> to vector<2x8x16xbf16>
    %53 = vector.extract_strided_slice %48 {offsets = [0, 32], sizes = [16, 16], strides = [1, 1]} : vector<16x64xbf16> to vector<16x16xbf16>
    %54 = vector.shape_cast %53 : vector<16x16xbf16> to vector<2x8x16xbf16>
    %55 = vector.extract_strided_slice %48 {offsets = [0, 48], sizes = [16, 16], strides = [1, 1]} : vector<16x64xbf16> to vector<16x16xbf16>
    %56 = vector.shape_cast %55 : vector<16x16xbf16> to vector<2x8x16xbf16>
    %57 = tpu.concatenate %50, %52, %54, %56 in 0 : vector<2x8x16xbf16>, vector<2x8x16xbf16>, vector<2x8x16xbf16>, vector<2x8x16xbf16> -> vector<8x8x16xbf16>
    "tpu.trace_start"() <{level = 10 : i32, message = "bqd,bkd->bqk"}> : () -> ()
    %cst_13 = arith.constant dense<0.000000e+00> : vector<8x8x8xf32>
    %58 = tpu.matmul %37, %47, %cst_13 {dimension_numbers = #tpu.dot_dimension_numbers<[2], [2], [1], [1], [0, 0, 0, 1, 1, 1], [0], [0]>} : vector<8x8x16xbf16>, vector<8x8x16xbf16>, vector<8x8x8xf32> -> vector<8x8x8xf32>
    "tpu.trace_stop"() : () -> ()
    %cst_14 = arith.constant dense<0xFF800000> : vector<8x8xf32>
    %59 = vector.multi_reduction <maximumf>, %58, %cst_14 [2] : vector<8x8x8xf32> to vector<8x8xf32>
    %60 = vector.shape_cast %59 : vector<8x8xf32> to vector<8x8x1xf32>
    %61 = vector.broadcast %60 : vector<8x8x1xf32> to vector<8x8x8xf32>
    %62 = arith.subf %58, %61 : vector<8x8x8xf32>
    %63 = math.exp %62 : vector<8x8x8xf32>
    %cst_15 = arith.constant dense<0.000000e+00> : vector<8x8xf32>
    %64 = vector.multi_reduction <add>, %63, %cst_15 [2] : vector<8x8x8xf32> to vector<8x8xf32>
    %65 = vector.shape_cast %64 : vector<8x8xf32> to vector<8x8x1xf32>
    %66 = tpu.reciprocal %65 {approx = true} : vector<8x8x1xf32> -> vector<8x8x1xf32>
    %67 = vector.broadcast %66 : vector<8x8x1xf32> to vector<8x8x8xf32>
    %68 = arith.mulf %63, %67 : vector<8x8x8xf32>
    %69 = arith.truncf %68 : vector<8x8x8xf32> to vector<8x8x8xbf16>
    "tpu.trace_start"() <{level = 10 : i32, message = "bqk,bkd->bqd"}> : () -> ()
    %cst_16 = arith.constant dense<0.000000e+00> : vector<8x8x16xf32>
    %70 = tpu.matmul %69, %57, %cst_16 {dimension_numbers = #tpu.dot_dimension_numbers<[2], [1], [1], [2], [0, 0, 0, 1, 1, 2], [0], [0]>} : vector<8x8x8xbf16>, vector<8x8x16xbf16>, vector<8x8x16xf32> -> vector<8x8x16xf32>
    "tpu.trace_stop"() : () -> ()
    %71 = arith.truncf %70 : vector<8x8x16xf32> to vector<8x8x16xbf16>
    %72 = vector.shape_cast %71 : vector<8x8x16xbf16> to vector<4x16x16xbf16>
    %73 = vector.extract_strided_slice %72 {offsets = [0, 0, 0], sizes = [1, 16, 16], strides = [1, 1, 1]} : vector<4x16x16xbf16> to vector<1x16x16xbf16>
    %74 = vector.shape_cast %73 : vector<1x16x16xbf16> to vector<16x16xbf16>
    %75 = vector.extract_strided_slice %72 {offsets = [1, 0, 0], sizes = [1, 16, 16], strides = [1, 1, 1]} : vector<4x16x16xbf16> to vector<1x16x16xbf16>
    %76 = vector.shape_cast %75 : vector<1x16x16xbf16> to vector<16x16xbf16>
    %77 = vector.extract_strided_slice %72 {offsets = [2, 0, 0], sizes = [1, 16, 16], strides = [1, 1, 1]} : vector<4x16x16xbf16> to vector<1x16x16xbf16>
    %78 = vector.shape_cast %77 : vector<1x16x16xbf16> to vector<16x16xbf16>
    %79 = vector.extract_strided_slice %72 {offsets = [3, 0, 0], sizes = [1, 16, 16], strides = [1, 1, 1]} : vector<4x16x16xbf16> to vector<1x16x16xbf16>
    %80 = vector.shape_cast %79 : vector<1x16x16xbf16> to vector<16x16xbf16>
    %81 = tpu.concatenate %74, %76, %78, %80 in 1 : vector<16x16xbf16>, vector<16x16xbf16>, vector<16x16xbf16>, vector<16x16xbf16> -> vector<16x64xbf16>
    %c0_17 = arith.constant 0 : index
    %c0_18 = arith.constant 0 : index
    %82 = vector.load %arg5[%c0_17, %c0_18] : memref<64x32xbf16, #tpu.memory_space<vmem>>, vector<64x32xbf16>
    %cst_19 = arith.constant dense<0.000000e+00> : vector<16x32xf32>
    %83 = tpu.matmul %81, %82, %cst_19 {dimension_numbers = #tpu.dot_dimension_numbers<[1], [0], [0], [1], [0, 0, 1, 1], [], []>} : vector<16x64xbf16>, vector<64x32xbf16>, vector<16x32xf32> -> vector<16x32xf32>
    %84 = vector.shape_cast %83 : vector<16x32xf32> to vector<2x256xf32>
    %c0_20 = arith.constant 0 : index
    %c0_21 = arith.constant 0 : index
    %85 = vector.load %arg6[%c0_20, %c0_21] : memref<2x256xf32, #tpu.memory_space<vmem>>, vector<2x256xf32>
    tpu.vector_store %arg6[%c0_20, %c0_21], %84 {strides = array<i32>} : memref<2x256xf32, #tpu.memory_space<vmem>>, vector<2x256xf32>,
    return
  }
  func.func @transform_0(%arg0: i32) -> (i32, i32, i32) {
    %c0_i32 = arith.constant 0 : i32
    %c0_i32_0 = arith.constant 0 : i32
    %c0_i32_1 = arith.constant 0 : i32
    return %arg0, %c0_i32, %c0_i32_0 : i32, i32, i32
  }
  func.func @transform_1(%arg0: i32) -> (i32, i32) {
    %c0_i32 = arith.constant 0 : i32
    %c0_i32_0 = arith.constant 0 : i32
    %c0_i32_1 = arith.constant 0 : i32
    return %c0_i32, %c0_i32_0 : i32, i32
  }
  func.func @transform_2(%arg0: i32) -> (i32, i32) {
    %c0_i32 = arith.constant 0 : i32
    %c0_i32_0 = arith.constant 0 : i32
    %c0_i32_1 = arith.constant 0 : i32
    return %c0_i32, %c0_i32_0 : i32, i32
  }
  func.func @transform_3(%arg0: i32) -> (i32, i32) {
    %c0_i32 = arith.constant 0 : i32
    %c0_i32_0 = arith.constant 0 : i32
    %c0_i32_1 = arith.constant 0 : i32
    return %c0_i32, %c0_i32_0 : i32, i32
  }
  func.func @transform_4(%arg0: i32) -> (i32, i32) {
    %c0_i32 = arith.constant 0 : i32
    %c0_i32_0 = arith.constant 0 : i32
    %c0_i32_1 = arith.constant 0 : i32
    return %c0_i32, %c0_i32_0 : i32, i32
  }
  func.func @transform_5(%arg0: i32) -> (i32, i32) {
    %c0_i32 = arith.constant 0 : i32
    %c0_i32_0 = arith.constant 0 : i32
    return %arg0, %c0_i32 : i32, i32
  }
}

module attributes {stable_mosaic.version = 11 : i64} {
  func.func @attention_kernel(%arg0: i32, %arg1: memref<2x8x32xf32, #tpu.memory_space<vmem>>, %arg2: memref<1x32xf32, #tpu.memory_space<vmem>>, %arg3: memref<1x32xf32, #tpu.memory_space<vmem>>, %arg4: memref<32x192xbf16, #tpu.memory_space<vmem>>, %arg5: memref<64x32xbf16, #tpu.memory_space<vmem>>, %arg6: memref<2x8x32xf32, #tpu.memory_space<vmem>>) attributes {dimension_semantics = [#tpu.dimension_semantics<parallel>], iteration_bounds = array<i64: 1>, scalar_prefetch = 0 : i64, scratch_operands = 0 : i64, tpu.core_type = #tpu.core_type<tc>, window_params = [{transform_indices = @transform_0, window_bounds = array<i64: 2, 8, 32>}, {pipeline_mode = #tpu.pipeline_mode<synchronous>, transform_indices = @transform_1, window_bounds = array<i64: 1, 32>}, {pipeline_mode = #tpu.pipeline_mode<synchronous>, transform_indices = @transform_2, window_bounds = array<i64: 1, 32>}, {pipeline_mode = #tpu.pipeline_mode<synchronous>, transform_indices = @transform_3, window_bounds = array<i64: 32, 192>}, {pipeline_mode = #tpu.pipeline_mode<synchronous>, transform_indices = @transform_4, window_bounds = array<i64: 64, 32>}, {transform_indices = @transform_5, window_bounds = array<i64: 2, 8, 32>}]} {
    %c0 = arith.constant 0 : index
    %c0_0 = arith.constant 0 : index
    %c0_1 = arith.constant 0 : index
    %0 = vector.load %arg1[%c0, %c0_0, %c0_1] : memref<2x8x32xf32, #tpu.memory_space<vmem>>, vector<2x8x32xf32>
    %1 = vector.shape_cast %0 : vector<2x8x32xf32> to vector<16x32xf32>
    %cst = arith.constant dense<0.000000e+00> : vector<16xf32>
    %2 = vector.multi_reduction <add>, %1, %cst [1] : vector<16x32xf32> to vector<16xf32>
    %3 = vector.shape_cast %2 : vector<16xf32> to vector<16x1xf32>
    %cst_2 = arith.constant 3.200000e+01 : f32
    %4 = vector.broadcast %cst_2 : f32 to vector<16x1xf32>
    %5 = arith.divf %3, %4 : vector<16x1xf32>
    %6 = vector.broadcast %5 : vector<16x1xf32> to vector<16x32xf32>
    %7 = arith.subf %1, %6 : vector<16x32xf32>
    %8 = arith.mulf %7, %7 : vector<16x32xf32>
    %cst_3 = arith.constant dense<0.000000e+00> : vector<16xf32>
    %9 = vector.multi_reduction <add>, %8, %cst_3 [1] : vector<16x32xf32> to vector<16xf32>
    %10 = vector.shape_cast %9 : vector<16xf32> to vector<16x1xf32>
    %cst_4 = arith.constant 3.200000e+01 : f32
    %11 = vector.broadcast %cst_4 : f32 to vector<16x1xf32>
    %12 = arith.divf %10, %11 : vector<16x1xf32>
    %cst_5 = arith.constant 9.99999974E-6 : f32
    %13 = vector.broadcast %cst_5 : f32 to vector<16x1xf32>
    %14 = arith.addf %12, %13 : vector<16x1xf32>
    %15 = math.rsqrt %14 : vector<16x1xf32>
    %16 = vector.broadcast %15 : vector<16x1xf32> to vector<16x32xf32>
    %17 = arith.mulf %7, %16 : vector<16x32xf32>
    %c0_6 = arith.constant 0 : index
    %c0_7 = arith.constant 0 : index
    %18 = vector.load %arg2[%c0_6, %c0_7] : memref<1x32xf32, #tpu.memory_space<vmem>>, vector<1x32xf32>
    %19 = vector.broadcast %18 : vector<1x32xf32> to vector<16x32xf32>
    %20 = arith.mulf %17, %19 : vector<16x32xf32>
    %c0_8 = arith.constant 0 : index
    %c0_9 = arith.constant 0 : index
    %21 = vector.load %arg3[%c0_8, %c0_9] : memref<1x32xf32, #tpu.memory_space<vmem>>, vector<1x32xf32>
    %22 = vector.broadcast %21 : vector<1x32xf32> to vector<16x32xf32>
    %23 = arith.addf %20, %22 : vector<16x32xf32>
    %24 = arith.truncf %23 : vector<16x32xf32> to vector<16x32xbf16>
    %c0_10 = arith.constant 0 : index
    %c0_11 = arith.constant 0 : index
    %25 = vector.load %arg4[%c0_10, %c0_11] : memref<32x192xbf16, #tpu.memory_space<vmem>>, vector<32x192xbf16>
    %cst_12 = arith.constant dense<0.000000e+00> : vector<16x192xf32>
    %26 = tpu.matmul %24, %25, %cst_12 {dimension_numbers = #tpu.dot_dimension_numbers<[1], [0], [0], [1], [0, 0, 1, 1], [], []>} : vector<16x32xbf16>, vector<32x192xbf16>, vector<16x192xf32> -> vector<16x192xf32>
    %27 = arith.truncf %26 : vector<16x192xf32> to vector<16x192xbf16>
    %28 = vector.extract_strided_slice %27 {offsets = [0, 0], sizes = [16, 64], strides = [1, 1]} : vector<16x192xbf16> to vector<16x64xbf16>
    %29 = vector.extract_strided_slice %28 {offsets = [0, 0], sizes = [16, 16], strides = [1, 1]} : vector<16x64xbf16> to vector<16x16xbf16>
    %30 = vector.shape_cast %29 : vector<16x16xbf16> to vector<2x8x16xbf16>
    %31 = vector.extract_strided_slice %28 {offsets = [0, 16], sizes = [16, 16], strides = [1, 1]} : vector<16x64xbf16> to vector<16x16xbf16>
    %32 = vector.shape_cast %31 : vector<16x16xbf16> to vector<2x8x16xbf16>
    %33 = vector.extract_strided_slice %28 {offsets = [0, 32], sizes = [16, 16], strides = [1, 1]} : vector<16x64xbf16> to vector<16x16xbf16>
    %34 = vector.shape_cast %33 : vector<16x16xbf16> to vector<2x8x16xbf16>
    %35 = vector.extract_strided_slice %28 {offsets = [0, 48], sizes = [16, 16], strides = [1, 1]} : vector<16x64xbf16> to vector<16x16xbf16>
    %36 = vector.shape_cast %35 : vector<16x16xbf16> to vector<2x8x16xbf16>
    %37 = tpu.concatenate %30, %32, %34, %36 in 0 : vector<2x8x16xbf16>, vector<2x8x16xbf16>, vector<2x8x16xbf16>, vector<2x8x16xbf16> -> vector<8x8x16xbf16>
    %38 = vector.extract_strided_slice %27 {offsets = [0, 64], sizes = [16, 64], strides = [1, 1]} : vector<16x192xbf16> to vector<16x64xbf16>
    %39 = vector.extract_strided_slice %38 {offsets = [0, 0], sizes = [16, 16], strides = [1, 1]} : vector<16x64xbf16> to vector<16x16xbf16>
    %40 = vector.shape_cast %39 : vector<16x16xbf16> to vector<2x8x16xbf16>
    %41 = vector.extract_strided_slice %38 {offsets = [0, 16], sizes = [16, 16], strides = [1, 1]} : vector<16x64xbf16> to vector<16x16xbf16>
    %42 = vector.shape_cast %41 : vector<16x16xbf16> to vector<2x8x16xbf16>
    %43 = vector.extract_strided_slice %38 {offsets = [0, 32], sizes = [16, 16], strides = [1, 1]} : vector<16x64xbf16> to vector<16x16xbf16>
    %44 = vector.shape_cast %43 : vector<16x16xbf16> to vector<2x8x16xbf16>
    %45 = vector.extract_strided_slice %38 {offsets = [0, 48], sizes = [16, 16], strides = [1, 1]} : vector<16x64xbf16> to vector<16x16xbf16>
    %46 = vector.shape_cast %45 : vector<16x16xbf16> to vector<2x8x16xbf16>
    %47 = tpu.concatenate %40, %42, %44, %46 in 0 : vector<2x8x16xbf16>, vector<2x8x16xbf16>, vector<2x8x16xbf16>, vector<2x8x16xbf16> -> vector<8x8x16xbf16>
    %48 = vector.extract_strided_slice %27 {offsets = [0, 128], sizes = [16, 64], strides = [1, 1]} : vector<16x192xbf16> to vector<16x64xbf16>
    %49 = vector.extract_strided_slice %48 {offsets = [0, 0], sizes = [16, 16], strides = [1, 1]} : vector<16x64xbf16> to vector<16x16xbf16>
    %50 = vector.shape_cast %49 : vector<16x16xbf16> to vector<2x8x16xbf16>
    %51 = vector.extract_strided_slice %48 {offsets = [0, 16], sizes = [16, 16], strides = [1, 1]} : vector<16x64xbf16> to vector<16x16xbf16>
    %52 = vector.shape_cast %51 : vector<16x16xbf16> to vector<2x8x16xbf16>
    %53 = vector.extract_strided_slice %48 {offsets = [0, 32], sizes = [16, 16], strides = [1, 1]} : vector<16x64xbf16> to vector<16x16xbf16>
    %54 = vector.shape_cast %53 : vector<16x16xbf16> to vector<2x8x16xbf16>
    %55 = vector.extract_strided_slice %48 {offsets = [0, 48], sizes = [16, 16], strides = [1, 1]} : vector<16x64xbf16> to vector<16x16xbf16>
    %56 = vector.shape_cast %55 : vector<16x16xbf16> to vector<2x8x16xbf16>
    %57 = tpu.concatenate %50, %52, %54, %56 in 0 : vector<2x8x16xbf16>, vector<2x8x16xbf16>, vector<2x8x16xbf16>, vector<2x8x16xbf16> -> vector<8x8x16xbf16>
    "tpu.trace_start"() <{level = 10 : i32, message = "bqd,bkd->bqk"}> : () -> ()
    %cst_13 = arith.constant dense<0.000000e+00> : vector<8x8x8xf32>
    %58 = tpu.matmul %37, %47, %cst_13 {dimension_numbers = #tpu.dot_dimension_numbers<[2], [2], [1], [1], [0, 0, 0, 1, 1, 1], [0], [0]>} : vector<8x8x16xbf16>, vector<8x8x16xbf16>, vector<8x8x8xf32> -> vector<8x8x8xf32>
    "tpu.trace_stop"() : () -> ()
    %cst_14 = arith.constant dense<0xFF800000> : vector<8x8xf32>
    %59 = vector.multi_reduction <maximumf>, %58, %cst_14 [2] : vector<8x8x8xf32> to vector<8x8xf32>
    %60 = vector.shape_cast %59 : vector<8x8xf32> to vector<8x8x1xf32>
    %61 = vector.broadcast %60 : vector<8x8x1xf32> to vector<8x8x8xf32>
    %62 = arith.subf %58, %61 : vector<8x8x8xf32>
    %63 = math.exp %62 : vector<8x8x8xf32>
    %cst_15 = arith.constant dense<0.000000e+00> : vector<8x8xf32>
    %64 = vector.multi_reduction <add>, %63, %cst_15 [2] : vector<8x8x8xf32> to vector<8x8xf32>
    %65 = vector.shape_cast %64 : vector<8x8xf32> to vector<8x8x1xf32>
    %66 = tpu.reciprocal %65 {approx = true} : vector<8x8x1xf32> -> vector<8x8x1xf32>
    %67 = vector.broadcast %66 : vector<8x8x1xf32> to vector<8x8x8xf32>
    %68 = arith.mulf %63, %67 : vector<8x8x8xf32>
    %69 = arith.truncf %68 : vector<8x8x8xf32> to vector<8x8x8xbf16>
    "tpu.trace_start"() <{level = 10 : i32, message = "bqk,bkd->bqd"}> : () -> ()
    %cst_16 = arith.constant dense<0.000000e+00> : vector<8x8x16xf32>
    %70 = tpu.matmul %69, %57, %cst_16 {dimension_numbers = #tpu.dot_dimension_numbers<[2], [1], [1], [2], [0, 0, 0, 1, 1, 2], [0], [0]>} : vector<8x8x8xbf16>, vector<8x8x16xbf16>, vector<8x8x16xf32> -> vector<8x8x16xf32>
    "tpu.trace_stop"() : () -> ()
    %71 = arith.truncf %70 : vector<8x8x16xf32> to vector<8x8x16xbf16>
    %72 = vector.shape_cast %71 : vector<8x8x16xbf16> to vector<4x16x16xbf16>
    %73 = vector.extract_strided_slice %72 {offsets = [0, 0, 0], sizes = [1, 16, 16], strides = [1, 1, 1]} : vector<4x16x16xbf16> to vector<1x16x16xbf16>
    %74 = vector.shape_cast %73 : vector<1x16x16xbf16> to vector<16x16xbf16>
    %75 = vector.extract_strided_slice %72 {offsets = [1, 0, 0], sizes = [1, 16, 16], strides = [1, 1, 1]} : vector<4x16x16xbf16> to vector<1x16x16xbf16>
    %76 = vector.shape_cast %75 : vector<1x16x16xbf16> to vector<16x16xbf16>
    %77 = vector.extract_strided_slice %72 {offsets = [2, 0, 0], sizes = [1, 16, 16], strides = [1, 1, 1]} : vector<4x16x16xbf16> to vector<1x16x16xbf16>
    %78 = vector.shape_cast %77 : vector<1x16x16xbf16> to vector<16x16xbf16>
    %79 = vector.extract_strided_slice %72 {offsets = [3, 0, 0], sizes = [1, 16, 16], strides = [1, 1, 1]} : vector<4x16x16xbf16> to vector<1x16x16xbf16>
    %80 = vector.shape_cast %79 : vector<1x16x16xbf16> to vector<16x16xbf16>
    %81 = tpu.concatenate %74, %76, %78, %80 in 1 : vector<16x16xbf16>, vector<16x16xbf16>, vector<16x16xbf16>, vector<16x16xbf16> -> vector<16x64xbf16>
    %c0_17 = arith.constant 0 : index
    %c0_18 = arith.constant 0 : index
    %82 = vector.load %arg5[%c0_17, %c0_18] : memref<64x32xbf16, #tpu.memory_space<vmem>>, vector<64x32xbf16>
    %cst_19 = arith.constant dense<0.000000e+00> : vector<16x32xf32>
    %83 = tpu.matmul %81, %82, %cst_19 {dimension_numbers = #tpu.dot_dimension_numbers<[1], [0], [0], [1], [0, 0, 1, 1], [], []>} : vector<16x64xbf16>, vector<64x32xbf16>, vector<16x32xf32> -> vector<16x32xf32>
    %84 = vector.shape_cast %83 : vector<16x32xf32> to vector<2x8x32xf32>
    %c0_20 = arith.constant 0 : index
    %c0_21 = arith.constant 0 : index
    %c0_22 = arith.constant 0 : index
    %85 = vector.load %arg6[%c0_20, %c0_21, %c0_22] : memref<2x8x32xf32, #tpu.memory_space<vmem>>, vector<2x8x32xf32>
    tpu.vector_store %arg6[%c0_20, %c0_21, %c0_22], %84 {strides = array<i32>} : memref<2x8x32xf32, #tpu.memory_space<vmem>>, vector<2x8x32xf32>,
    return
  }
  func.func @transform_0(%arg0: i32) -> (i32, i32, i32) {
    %c0_i32 = arith.constant 0 : i32
    %c0_i32_0 = arith.constant 0 : i32
    %c0_i32_1 = arith.constant 0 : i32
    return %arg0, %c0_i32, %c0_i32_0 : i32, i32, i32
  }
  func.func @transform_1(%arg0: i32) -> (i32, i32) {
    %c0_i32 = arith.constant 0 : i32
    %c0_i32_0 = arith.constant 0 : i32
    %c0_i32_1 = arith.constant 0 : i32
    return %c0_i32, %c0_i32_0 : i32, i32
  }
  func.func @transform_2(%arg0: i32) -> (i32, i32) {
    %c0_i32 = arith.constant 0 : i32
    %c0_i32_0 = arith.constant 0 : i32
    %c0_i32_1 = arith.constant 0 : i32
    return %c0_i32, %c0_i32_0 : i32, i32
  }
  func.func @transform_3(%arg0: i32) -> (i32, i32) {
    %c0_i32 = arith.constant 0 : i32
    %c0_i32_0 = arith.constant 0 : i32
    %c0_i32_1 = arith.constant 0 : i32
    return %c0_i32, %c0_i32_0 : i32, i32
  }
  func.func @transform_4(%arg0: i32) -> (i32, i32) {
    %c0_i32 = arith.constant 0 : i32
    %c0_i32_0 = arith.constant 0 : i32
    %c0_i32_1 = arith.constant 0 : i32
    return %c0_i32, %c0_i32_0 : i32, i32
  }
  func.func @transform_5(%arg0: i32) -> (i32, i32, i32) {
    %c0_i32 = arith.constant 0 : i32
    %c0_i32_0 = arith.constant 0 : i32
    %c0_i32_1 = arith.constant 0 : i32
    return %arg0, %c0_i32, %c0_i32_0 : i32, i32, i32
  }
}

</mosaic_0001>

<bundles_post_ra>
// kernel: tpu_custom_call.1
= control target key start
LH: loop header
LB: loop body
LE: loop exit
PB: predicated region body
PF: predicated region fallthrough
CT: control target
= control target key end

     0   :  { %vm24_vm0 = vcmask 261120   ;;  %s1720_s0 = inlined_call_operand.vmem [shape: f32[2,8,32], index: 0, kind: input, shape index: {}]   ;;  %s1721_s1 = inlined_call_operand.vmem [shape: f32[1,32], index: 1, kind: input, shape index: {}]   ;;  %s1722_s2 = inlined_call_operand.vmem [shape: f32[1,32], index: 2, kind: input, shape index: {}]   ;;  %s1723_s3 = inlined_call_operand.vmem [shape: bf16[32,192], index: 3, kind: input, shape index: {}]   ;;  %s1724_s4 = inlined_call_operand.vmem [shape: bf16[64,32], index: 4, kind: input, shape index: {}]   ;;  %s1725_s5 = inlined_call_operand.hbm [shape: f32[2,8,32], index: 5, kind: output, shape index: {}]  }
   0x1   :  { %v22_v0 = vld [vmem:[%s1720_s0] sm:$0xff]  ;;  %v23_v1 = vld [vmem:[%s1720_s0 + $0x8] sm:$0xff] }
   0x2   :  { %v25_v2 = vsel %vm24_vm0, %v22_v0, 0.0  ;;  %v28_v3 = vsel %vm24_vm0, %v23_v1, 0.0 }
   0x3   :  { %26 = vadd.xlane.f32.xlu0 %v25_v2 }
   0x4   :  { %10 = vsyncpa [#allocation3], 0  ;;  %v1384_v14 = vld [vmem:[%s1723_s3 + $0x4] ss:$8 sps:$4 sm:$0xff]   ;;  %v1386_v15 = vld [vmem:[%s1723_s3] ss:$8 sps:$4 sm:$0xff]  }
   0x5   :  { %98 = vmatprep.subr.bf16.mxu0 %v1384_v14  ;;  %v1387_v16 = vld [vmem:[%s1723_s3 + $0x14] ss:$8 sps:$4 sm:$0xff]   ;;  %v1389_v17 = vld [vmem:[%s1723_s3 + $0x10] ss:$8 sps:$4 sm:$0xff]   ;;  %v1454_v18 = vmov 0   ;;  %v1455_v36 = vmov 0.0  }
   0x6   :  { %99 = vmatpush1.bf16.msra.mxu0 %v1386_v15  ;;  %130 = vmatprep.mubr.bf16.mxu0 %v1454_v18  ;;  %v1176_v27 = vld [vmem:[%s1721_s1] ss:$0 sm:$0xff]  ;;  %s1456_s1 = smov 112   ;;  %vm1457_vm1 = vmmov 0   ;;  %s1459_s7 = smov 96   ;;  %vm179_vm2 = vcmask 130048  }
   0x7   :  { %29 = vadd.xlane.f32.xlu0 %v28_v3  ;;  %100 = vmatprep.subr.bf16.mxu0 %v1387_v16  ;;  %v1177_v31 = vld [vmem:[%s1722_s2] ss:$0 sm:$0xff]  ;;  %s1458_s2 = smov 80   ;;  %s1460_s8 = smov 64   ;;  %vm674_vm3 = vcmask 1043456   ;;  %vm574_vm4 = vcmask 64512  }
   0x8   :  { %1263 = vmatprep.subr.bf16.mxu1 %v1455_v36  ;;  %1265 = vmatprep.mubr.msk.bf16.mxu1 %vm1457_vm1, %v1455_v36  ;;  %s1461_s13 = smov 16   ;;  %s1462_s18 = smov 32   ;;  %vm1079_vm5 = vcmask 392192   ;;  %vm1114_vm6 = vcmask 523264  }
   0x9   :  { %s1463_s19 = smov 48  }
   0xa   :  { %101 = vmatpush1.bf16.msra.mxu0 %v1389_v17 }
   0xb   :  { %1269 = vmatprep.subr.bf16.mxu0 %v1455_v36 }
  0x90   :  { %v27_v4 = vpop.xlane.xlu0 %26 }
  0x91   :  { %v32_v5 = vmul.f32 0.03125, %v27_v4 }
  0x93   :  { %v34_v6 = vsub.f32 %v22_v0, %v32_v5 }
  0x94   :  { %v30_v7 = vpop.xlane.xlu0 %29 }
  0x95   :  { %v33_v8 = vmul.f32 0.03125, %v30_v7  ;;  %v36_v9 = vmul.f32 %v34_v6, %v34_v6 }
  0x97   :  { %v35_v10 = vsub.f32 %v23_v1, %v33_v8  ;;  %v38_v11 = vsel %vm24_vm0, %v36_v9, 0.0 }
  0x98   :  { %39 = vadd.xlane.f32.xlu1 %v38_v11 }
  0x99   :  { %v37_v12 = vmul.f32 %v35_v10, %v35_v10 }
  0x9b   :  { %v41_v13 = vsel %vm24_vm0, %v37_v12, 0.0 }
  0x9c   :  { %42 = vadd.xlane.f32.xlu1 %v41_v13 }
 0x125   :  { %v40_v19 = vpop.xlane.xlu1 %39 }
 0x126   :  { %v44_v20 = vmul.f32 0.03125, %v40_v19 }
 0x128   :  { %v46_v21 = vadd.f32 1e-05, %v44_v20 }
 0x129   :  { %v43_v22 = vpop.xlane.xlu1 %42 }
 0x12a   :  { %1394 = vrsqrt.f32 %v46_v21  ;;  %v45_v23 = vmul.f32 0.03125, %v43_v22 }
 0x12c   :  { %v47_v24 = vadd.f32 1e-05, %v45_v23 }
 0x12e   :  { %1396 = vrsqrt.f32 %v47_v24 }
 0x134   :  { %v1395_v25 = vpop.eup %1394 }
 0x135   :  { %v50_v26 = vmul.f32 %v1395_v25, %v34_v6 }
 0x137   :  { %v59_v30 = vmul.f32 %v1176_v27, %v50_v26 }
 0x138   :  { %v1397_v28 = vpop.eup %1396 }
 0x139   :  { %v51_v29 = vmul.f32 %v1397_v28, %v35_v10  ;;  %v68_v33 = vadd.f32 %v1177_v31, %v59_v30 }
 0x13b   :  { %v60_v32 = vmul.f32 %v1176_v27, %v51_v29 }
 0x13d   :  { %v69_v34 = vadd.f32 %v1177_v31, %v60_v32 }
 0x13f   :  { %v70_v35 = vpack.c.bf16 %v69_v34, %v68_v33 }
 0x141   :  { %1182 = vmatmul.mubr.msk.bf16.vlgmr.msra.gmra.mrb[0].mxu0 %vm24_vm0, %v70_v35 }
 0x142   :  { %1271 = vmatprep.mubr.msk.bf16.mxu0 %vm1457_vm1, %v1455_v36 }
 0x214   :  { %v132_v37 = vpop.f32.mrb[0].mxu0 }
 0x215   :  { %v1218_v38 = vpack.c.bf16 %v132_v37, %v132_v37  ;;  %v1528_v39 = vpop.f32.mrb[1].mxu0 }
 0x216   :  { %v136_v40 = vpop.f32.mrb[2].mxu0  ;;  %v1577_v7 = vpack.c.bf16 %v1528_v39, %v1528_v39 }
 0x217   :  { %v1219_v41 = vpack.c.bf16 %v136_v40, %v136_v40  ;;  %148 = vrot.lane.b32.xlu0 %v1218_v38, %s1456_s1  ;;  %v1531_v42 = vpop.f32.mrb[3].mxu0 }
 0x218   :  { %v1582_v8 = vpack.c.bf16 %v1531_v42, %v1531_v42  ;;  %v676_v9 = vsel %vm674_vm3, %v1577_v7, 0 }
 0x219   :  { %150 = vrot.lane.b32.xlu1 %v1219_v41, %s1456_s1 }
 0x21a   :  { %v722_v10 = vsel %vm674_vm3, %v1582_v8, 0 }
 0x21b   :  { %156 = vrot.lane.b32.xlu0 %v1218_v38, %s1458_s2 }
 0x21d   :  { %152 = vrot.lane.b32.xlu1 %v1218_v38, %s1459_s7 }
 0x21f   :  { %177 = vrot.lane.b32.xlu0 %v1218_v38, %s1460_s8 }
 0x221   :  { %154 = vrot.lane.b32.xlu1 %v1219_v41, %s1459_s7 }
 0x225   :  { %158 = vrot.lane.b32.xlu1 %v1219_v41, %s1458_s2 }
 0x229   :  { %226 = vrot.lane.b32.xlu1 %v1219_v41, %s1460_s8 }
 0x289   :  { %v149_v43 = vpop.permute.xlu0 %148 }
 0x28a   :  { %v1189_v44 = vcombine.low %v149_v43, %v149_v43 }
 0x28b   :  { %v151_v45 = vpop.permute.xlu1 %150 }
 0x28c   :  { %v1191_v46 = vcombine.low %v151_v45, %v151_v45  ;;  %276 = vrot.lane.b32.xlu0 %v1189_v44, %s1460_s8 }
 0x28d   :  { %v157_v47 = vpop.permute.xlu0 %156 }
 0x28e   :  { %326 = vrot.lane.b32.xlu1 %v1191_v46, %s1460_s8  ;;  %v1197_v53 = vcombine.low %v157_v47, %v157_v47 }
 0x28f   :  { %v153_v48 = vpop.permute.xlu1 %152 }
 0x290   :  { %v1193_v49 = vcombine.low %v153_v48, %v153_v48 }
 0x291   :  { %v178_v50 = vpop.permute.xlu0 %177 }
 0x292   :  { %376 = vrot.lane.b32.xlu0 %v1193_v49, %s1460_s8  ;;  %v184_v51 = vsel %vm179_vm2, %v178_v50, 0 }
 0x293   :  { %1264 = vmatpush3.bf16.xpose.msra.mxu1 %v184_v51  ;;  %v155_v52 = vpop.permute.xlu1 %154 }
 0x294   :  { %v1195_v54 = vcombine.low %v155_v52, %v155_v52  ;;  %1275 = vmatprep.subr.bf16.mxu1 %v1455_v36 }
 0x296   :  { %476 = vrot.lane.b32.xlu0 %v1197_v53, %s1460_s8  ;;  %426 = vrot.lane.b32.xlu1 %v1195_v54, %s1460_s8 }
 0x297   :  { %v159_v55 = vpop.permute.xlu1 %158 }
 0x298   :  { %v1199_v56 = vcombine.low %v159_v55, %v159_v55 }
 0x29a   :  { %1266 = vmatmul.mubr.msk.bf16.vlgmr.msra.gmra.mrb[0].mxu1 %vm179_vm2, %v1218_v38  ;;  %526 = vrot.lane.b32.xlu1 %v1199_v56, %s1460_s8 }
 0x29b   :  { %v227_v57 = vpop.permute.xlu1 %226  ;;  %1277 = vmatprep.mubr.msk.bf16.mxu1 %vm1457_vm1, %v1455_v36 }
 0x29c   :  { %v232_v58 = vsel %vm179_vm2, %v227_v57, 0 }
 0x29d   :  { %1270 = vmatpush3.bf16.xpose.msra.mxu0 %v232_v58 }
 0x29e   :  { %1281 = vmatprep.subr.bf16.mxu0 %v1455_v36 }
 0x2a4   :  { %1272 = vmatmul.mubr.msk.bf16.vlgmr.msra.gmra.mrb[4].mxu0 %vm179_vm2, %v1219_v41 }
 0x2a5   :  { %1283 = vmatprep.mubr.msk.bf16.mxu0 %vm1457_vm1, %v1455_v36 }
 0x2fe   :  { %v277_v59 = vpop.permute.xlu0 %276 }
 0x2ff   :  { %v282_v60 = vsel %vm179_vm2, %v277_v59, 0 }
 0x300   :  { %1276 = vmatpush3.bf16.xpose.msra.mxu1 %v282_v60  ;;  %v327_v61 = vpop.permute.xlu1 %326 }
 0x301   :  { %v332_v62 = vsel %vm179_vm2, %v327_v61, 0  ;;  %1287 = vmatprep.subr.bf16.mxu1 %v1455_v36 }
 0x302   :  { %1282 = vmatpush3.bf16.xpose.msra.mxu0 %v332_v62 }
 0x303   :  { %1293 = vmatprep.subr.bf16.mxu0 %v1455_v36 }
 0x304   :  { %v377_v63 = vpop.permute.xlu0 %376 }
 0x305   :  { %v382_v0 = vsel %vm179_vm2, %v377_v63, 0 }
 0x307   :  { %1278 = vmatmul.mubr.msk.bf16.vlgmr.msra.gmra.mrb[4].mxu1 %vm179_vm2, %v149_v43 }
 0x308   :  { %1288 = vmatpush3.bf16.xpose.msra.mxu1 %v382_v0  ;;  %v427_v1 = vpop.permute.xlu1 %426  ;;  %1289 = vmatprep.mubr.msk.bf16.mxu1 %vm1457_vm1, %v1455_v36  ;;  %v477_v3 = vpop.permute.xlu0 %476 }
 0x309   :  { %v432_v2 = vsel %vm179_vm2, %v427_v1, 0  ;;  %1284 = vmatmul.mubr.msk.bf16.vlgmr.msra.gmra.mrb[8].mxu0 %vm179_vm2, %v151_v45  ;;  %1299 = vmatprep.subr.bf16.mxu1 %v1455_v36  ;;  %v482_v5 = vsel %vm179_vm2, %v477_v3, 0 }
 0x30a   :  { %1294 = vmatpush3.bf16.xpose.msra.mxu0 %v432_v2  ;;  %1295 = vmatprep.mubr.msk.bf16.mxu0 %vm1457_vm1, %v1455_v36 }
 0x30b   :  { %1305 = vmatprep.subr.bf16.mxu0 %v1455_v36 }
 0x30c   :  { %v527_v4 = vpop.permute.xlu1 %526 }
 0x30d   :  { %v532_v6 = vsel %vm179_vm2, %v527_v4, 0 }
 0x30f   :  { %1290 = vmatmul.mubr.msk.bf16.vlgmr.msra.gmra.mrb[8].mxu1 %vm179_vm2, %v153_v48 }
 0x310   :  { %1300 = vmatpush3.bf16.xpose.msra.mxu1 %v482_v5  ;;  %1301 = vmatprep.mubr.msk.bf16.mxu1 %vm1457_vm1, %v1455_v36 }
 0x311   :  { %1296 = vmatmul.mubr.msk.bf16.vlgmr.msra.gmra.mrb[12].mxu0 %vm179_vm2, %v155_v52  ;;  %1311 = vmatprep.subr.bf16.mxu1 %v1455_v36 }
 0x312   :  { %1306 = vmatpush3.bf16.xpose.msra.mxu0 %v532_v6  ;;  %1307 = vmatprep.mubr.msk.bf16.mxu0 %vm1457_vm1, %v1455_v36 }
 0x313   :  { %1317 = vmatprep.subr.bf16.mxu0 %v1455_v36 }
 0x317   :  { %1302 = vmatmul.mubr.msk.bf16.vlgmr.msra.gmra.mrb[12].mxu1 %vm179_vm2, %v157_v47 }
 0x318   :  { %1312 = vmatpush3.bf16.msra.mxu1 %v676_v9  ;;  %1313 = vmatprep.mubr.msk.bf16.mxu1 %vm1457_vm1, %v1455_v36 }
 0x319   :  { %1308 = vmatmul.mubr.msk.bf16.vlgmr.msra.gmra.mrb[16].mxu0 %vm179_vm2, %v159_v55  ;;  %1323 = vmatprep.subr.bf16.mxu1 %v1455_v36 }
 0x31a   :  { %1318 = vmatpush3.bf16.msra.mxu0 %v722_v10  ;;  %1319 = vmatprep.mubr.msk.bf16.mxu0 %vm1457_vm1, %v1455_v36 }
 0x31b   :  { %1329 = vmatprep.subr.bf16.mxu0 %v1455_v36 }
 0x36d   :  { %v220_v11 = vpop.f32.mrb[0].mxu1 }
 0x36e   :  { %v1267_v12 = vpop.f32.mrb[1].mxu1  ;;  %v575_v13 = vsel %vm574_vm4, %v220_v11, -inf }
 0x36f   :  { %v223_v14 = vpop.f32.mrb[2].mxu1  ;;  %576 = vmax.xlane.f32.xlu0 %v575_v13 }
 0x370   :  { %v1268_v15 = vpop.f32.mrb[3].mxu1 }
 0x377   :  { %v268_v16 = vpop.f32.mrb[4].mxu0 }
 0x378   :  { %v1273_v17 = vpop.f32.mrb[5].mxu0  ;;  %v578_v18 = vsel %vm574_vm4, %v268_v16, -inf }
 0x379   :  { %579 = vmax.xlane.f32.xlu1 %v578_v18  ;;  %v271_v19 = vpop.f32.mrb[6].mxu0 }
 0x37a   :  { %v1274_v20 = vpop.f32.mrb[7].mxu0 }
 0x3da   :  { %v318_v21 = vpop.f32.mrb[4].mxu1 }
 0x3db   :  { %v1279_v22 = vpop.f32.mrb[5].mxu1  ;;  %v581_v23 = vsel %vm574_vm4, %v318_v21, -inf }
 0x3dc   :  { %v321_v24 = vpop.f32.mrb[6].mxu1  ;;  %582 = vmax.xlane.f32.xlu0 %v581_v23  ;;  %v368_v25 = vpop.f32.mrb[8].mxu0 }
 0x3dd   :  { %v1280_v26 = vpop.f32.mrb[7].mxu1  ;;  %v1285_v27 = vpop.f32.mrb[9].mxu0  ;;  %v584_v30 = vsel %vm574_vm4, %v368_v25, -inf }
 0x3de   :  { %v371_v28 = vpop.f32.mrb[10].mxu0 }
 0x3df   :  { %v1286_v29 = vpop.f32.mrb[11].mxu0 }
 0x3e0   :  { %585 = vmax.xlane.f32.xlu0 %v584_v30 }
 0x3e2   :  { %v1600_v31 = vpop.f32.mrb[8].mxu1 }
 0x3e3   :  { %v1291_v32 = vpop.f32.mrb[9].mxu1  ;;  %v587_v33 = vsel %vm574_vm4, %v1600_v31, -inf }
 0x3e4   :  { %v421_v34 = vpop.f32.mrb[10].mxu1  ;;  %588 = vmax.xlane.f32.xlu0 %v587_v33  ;;  %v468_v35 = vpop.f32.mrb[12].mxu0 }
 0x3e5   :  { %v1292_v37 = vpop.f32.mrb[11].mxu1  ;;  %v1297_v38 = vpop.f32.mrb[13].mxu0  ;;  %v590_v39 = vsel %vm574_vm4, %v468_v35, -inf }
 0x3e6   :  { %591 = vmax.xlane.f32.xlu1 %v590_v39  ;;  %v471_v40 = vpop.f32.mrb[14].mxu0 }
 0x3e7   :  { %v1298_v41 = vpop.f32.mrb[15].mxu0 }
 0x3ea   :  { %v1605_v42 = vpop.f32.mrb[12].mxu1 }
 0x3eb   :  { %v1303_v43 = vpop.f32.mrb[13].mxu1  ;;  %v593_v44 = vsel %vm574_vm4, %v1605_v42, -inf }
 0x3ec   :  { %v521_v45 = vpop.f32.mrb[14].mxu1  ;;  %594 = vmax.xlane.f32.xlu0 %v593_v44  ;;  %v568_v46 = vpop.f32.mrb[16].mxu0 }
 0x3ed   :  { %v1304_v47 = vpop.f32.mrb[15].mxu1  ;;  %v1309_v48 = vpop.f32.mrb[17].mxu0  ;;  %v596_v49 = vsel %vm574_vm4, %v568_v46, -inf }
 0x3ee   :  { %597 = vmax.xlane.f32.xlu1 %v596_v49  ;;  %v571_v50 = vpop.f32.mrb[18].mxu0 }
 0x3ef   :  { %v1310_v51 = vpop.f32.mrb[19].mxu0 }
 0x3fc   :  { %v577_v52 = vpop.xlane.xlu0 %576 }
 0x3fd   :  { %v599_v53 = vsub.f32 %v220_v11, %v577_v52 }
 0x3ff   :  { %v607_v54 = vmul.f32 1.442695, %v599_v53 }
 0x401   :  { %1398 = vpow2.f32 %v607_v54 }
 0x406   :  { %v580_v55 = vpop.xlane.xlu1 %579 }
 0x407   :  { %v600_v56 = vsub.f32 %v268_v16, %v580_v55 }
 0x409   :  { %v609_v57 = vmul.f32 1.442695, %v600_v56 }
 0x40b   :  { %v1399_v58 = vpop.eup %1398  ;;  %1400 = vpow2.f32 %v609_v57 }
 0x40c   :  { %v623_v59 = vsel %vm574_vm4, %v1399_v58, 0.0 }
 0x40d   :  { %624 = vadd.xlane.f32.xlu0 %v623_v59 }
 0x415   :  { %v1401_v60 = vpop.eup %1400 }
 0x416   :  { %v626_v61 = vsel %vm574_vm4, %v1401_v60, 0.0 }
 0x417   :  { %627 = vadd.xlane.f32.xlu1 %v626_v61 }
 0x428   :  { %167 = vrot.lane.b32.xlu1 %v1582_v8, %s1456_s1 }
 0x42c   :  { %169 = vrot.lane.b32.xlu1 %v1577_v7, %s1459_s7 }
 0x430   :  { %171 = vrot.lane.b32.xlu1 %v1582_v8, %s1459_s7 }
 0x469   :  { %v583_v62 = vpop.xlane.xlu0 %582 }
 0x46a   :  { %v601_v63 = vsub.f32 %v318_v21, %v583_v62 }
 0x46c   :  { %v611_v0 = vmul.f32 1.442695, %v601_v63 }
 0x46d   :  { %v586_v1 = vpop.xlane.xlu0 %585 }
 0x46e   :  { %1402 = vpow2.f32 %v611_v0  ;;  %v602_v2 = vsub.f32 %v368_v25, %v586_v1 }
 0x470   :  { %v613_v3 = vmul.f32 1.442695, %v602_v2 }
 0x471   :  { %v589_v20 = vpop.xlane.xlu0 %588 }
 0x472   :  { %1404 = vpow2.f32 %v613_v3  ;;  %v603_v22 = vsub.f32 %v1600_v31, %v589_v20  ;;  %v1390_v20 = vld [vmem:[%s1724_s4] sm:$0xff]  }
 0x473   :  { %v592_v4 = vpop.xlane.xlu1 %591 }
 0x474   :  { %v604_v5 = vsub.f32 %v468_v35, %v592_v4  ;;  %v615_v25 = vmul.f32 1.442695, %v603_v22 }
 0x476   :  { %v617_v6 = vmul.f32 1.442695, %v604_v5 }
 0x478   :  { %v1618_v9 = vpop.eup %1402  ;;  %1406 = vpow2.f32 %v617_v6 }
 0x479   :  { %v629_v10 = vsel %vm574_vm4, %v1618_v9, 0.0  ;;  %v595_v21 = vpop.xlane.xlu0 %594 }
 0x47a   :  { %630 = vadd.xlane.f32.xlu0 %v629_v10  ;;  %v605_v24 = vsub.f32 %v1605_v42, %v595_v21  ;;  %v1391_v21 = vld [vmem:[%s1724_s4 + $0x8] sm:$0xff]  }
 0x47b   :  { %v598_v11 = vpop.xlane.xlu1 %597 }
 0x47c   :  { %v1622_v12 = vpop.eup %1404  ;;  %v606_v13 = vsub.f32 %v568_v46, %v598_v11  ;;  %v619_v26 = vmul.f32 1.442695, %v605_v24 }
 0x47d   :  { %v632_v14 = vsel %vm574_vm4, %v1622_v12, 0.0 }
 0x47e   :  { %v621_v15 = vmul.f32 1.442695, %v606_v13  ;;  %633 = vadd.xlane.f32.xlu1 %v632_v14 }
 0x480   :  { %1408 = vpow2.f32 %v621_v15 }
 0x482   :  { %v1626_v16 = vpop.eup %1406 }
 0x483   :  { %v638_v17 = vsel %vm574_vm4, %v1626_v16, 0.0 }
 0x484   :  { %639 = vadd.xlane.f32.xlu1 %v638_v17 }
 0x48a   :  { %v1630_v18 = vpop.eup %1408 }
 0x48b   :  { %v644_v19 = vsel %vm574_vm4, %v1630_v18, 0.0 }
 0x48c   :  { %645 = vadd.xlane.f32.xlu1 %v644_v19 }
 0x490   :  { %165 = vrot.lane.b32.xlu0 %v1577_v7, %s1456_s1 }
 0x49a   :  { %v625_v23 = vpop.xlane.xlu0 %624 }
 0x49b   :  { %1410 = vrcp.f32 %v625_v23 }
 0x49c   :  { %1412 = vpow2.f32 %v615_v25 }
 0x49d   :  { %175 = vrot.lane.b32.xlu1 %v1582_v8, %s1458_s2  ;;  %1414 = vpow2.f32 %v619_v26 }
 0x4a4   :  { %v628_v27 = vpop.xlane.xlu1 %627 }
 0x4a5   :  { %v1411_v28 = vpop.eup %1410  ;;  %1416 = vrcp.f32 %v628_v27 }
 0x4a6   :  { %v655_v29 = vmul.f32 %v1411_v28, %v1399_v58  ;;  %v1641_v32 = vpop.eup %1412 }
 0x4a7   :  { %v1645_v31 = vpop.eup %1414  ;;  %v635_v8 = vsel %vm574_vm4, %v1641_v32, 0.0 }
 0x4a8   :  { %v663_v30 = vpack.c.bf16 %v655_v29, %v655_v29  ;;  %v168_v35 = vpop.permute.xlu1 %167  ;;  %v641_v37 = vsel %vm574_vm4, %v1645_v31, 0.0 }
 0x4a9   :  { %v814_v39 = vsel %vm674_vm3, %v168_v35, 0 }
 0x4aa   :  { %1314 = vmatmul.mubr.msk.bf16.vlgmr.msra.gmra.mrb[16].mxu1 %vm574_vm4, %v663_v30 }
 0x4ab   :  { %1325 = vmatprep.mubr.msk.bf16.mxu1 %vm1457_vm1, %v1455_v36 }
 0x4ac   :  { %v170_v40 = vpop.permute.xlu1 %169 }
 0x4af   :  { %v1417_v33 = vpop.eup %1416  ;;  %636 = vadd.xlane.f32.xlu0 %v635_v8 }
 0x4b0   :  { %v656_v34 = vmul.f32 %v1417_v33, %v1401_v60  ;;  %v172_v41 = vpop.permute.xlu1 %171 }
 0x4b1   :  { %v906_v54 = vsel %vm674_vm3, %v172_v41, 0 }
 0x4b2   :  { %v664_v38 = vpack.c.bf16 %v656_v34, %v656_v34 }
 0x4b3   :  { %642 = vadd.xlane.f32.xlu0 %v641_v37 }
 0x4b4   :  { %1320 = vmatmul.mubr.msk.bf16.vlgmr.msra.gmra.mrb[20].mxu0 %vm574_vm4, %v664_v38 }
 0x4b5   :  { %1330 = vmatpush3.bf16.msra.mxu0 %v814_v39  ;;  %1331 = vmatprep.mubr.msk.bf16.mxu0 %vm1457_vm1, %v1455_v36  ;;  %v1392_v39 = vld [vmem:[%s1724_s4 + $0x10] sm:$0xff]  }
 0x4b6   :  { %1341 = vmatprep.subr.bf16.mxu0 %v1455_v36 }
 0x4c9   :  { %173 = vrot.lane.b32.xlu0 %v1577_v7, %s1458_s2  ;;  %v860_v7 = vsel %vm674_vm3, %v170_v40, 0  ;;  %v1393_v40 = vld [vmem:[%s1724_s4 + $0x18] sm:$0xff]   ;;  %s1464_s4 = smov [#allocation2]  }
 0x4ca   :  { %s1165_s20 = sshll.u32 %s1464_s4, 4  ;;  %s1166_s20 = int_to_ptr.vmem [resolvable:$true] %s1165_s20 }
 0x4cb   :  { %s1430_s21 = scalar_lea.vmem %s1166_s20, 256  ;;  %p1435_p1 = scmp.lt.s32.totalorder %s1166_s20, %s1166_s20 }
 0x4cc   :  { %p1431_p0 = scmp.ne.s32.totalorder %s1166_s20, %s1430_s21  ;;  %p1436_p2 = scmp.lt.s32.totalorder %s1430_s21, %s1430_s21 }
 0x4ce   :  { %p1437_p3 = por %p1436_p2, %p1435_p1 }
 0x4d0   :  { %p1438_p4 = pnand %p1437_p3, %p1431_p0 }
 0x507   :  { %v631_v42 = vpop.xlane.xlu0 %630 }
 0x508   :  { %1418 = vrcp.f32 %v631_v42 }
 0x50b   :  { %v166_v43 = vpop.permute.xlu0 %165  ;;  %v634_v44 = vpop.xlane.xlu1 %633 }
 0x50c   :  { %v768_v45 = vsel %vm674_vm3, %v166_v43, 0  ;;  %1420 = vrcp.f32 %v634_v44 }
 0x50d   :  { %1324 = vmatpush3.bf16.msra.mxu1 %v768_v45 }
 0x50e   :  { %1335 = vmatprep.subr.bf16.mxu1 %v1455_v36 }
 0x511   :  { %v640_v46 = vpop.xlane.xlu1 %639 }
 0x512   :  { %v1419_v47 = vpop.eup %1418  ;;  %1422 = vrcp.f32 %v640_v46 }
 0x513   :  { %v657_v48 = vmul.f32 %v1419_v47, %v1618_v9 }
 0x515   :  { %v665_v49 = vpack.c.bf16 %v657_v48, %v657_v48 }
 0x516   :  { %v1421_v50 = vpop.eup %1420 }
 0x517   :  { %v658_v51 = vmul.f32 %v1421_v50, %v1622_v12  ;;  %1326 = vmatmul.mubr.msk.bf16.vlgmr.msra.gmra.mrb[20].mxu1 %vm574_vm4, %v665_v49 }
 0x518   :  { %1336 = vmatpush3.bf16.msra.mxu1 %v860_v7  ;;  %1337 = vmatprep.mubr.msk.bf16.mxu1 %vm1457_vm1, %v1455_v36 }
 0x519   :  { %v646_v52 = vpop.xlane.xlu1 %645  ;;  %v666_v53 = vpack.c.bf16 %v658_v51, %v658_v51  ;;  %1347 = vmatprep.subr.bf16.mxu1 %v1455_v36 }
 0x51a   :  { %1424 = vrcp.f32 %v646_v52 }
 0x51b   :  { %1332 = vmatmul.mubr.msk.bf16.vlgmr.msra.gmra.mrb[24].mxu0 %vm574_vm4, %v666_v53 }
 0x51c   :  { %v1423_v55 = vpop.eup %1422  ;;  %1342 = vmatpush3.bf16.msra.mxu0 %v906_v54  ;;  %1343 = vmatprep.mubr.msk.bf16.mxu0 %vm1457_vm1, %v1455_v36 }
 0x51d   :  { %v660_v56 = vmul.f32 %v1423_v55, %v1626_v16  ;;  %1353 = vmatprep.subr.bf16.mxu0 %v1455_v36  ;;  %v176_v57 = vpop.permute.xlu1 %175 }
 0x51e   :  { %v998_v59 = vsel %vm674_vm3, %v176_v57, 0 }
 0x51f   :  { %v668_v58 = vpack.c.bf16 %v660_v56, %v660_v56 }
 0x523   :  { %1344 = vmatmul.mubr.msk.bf16.vlgmr.msra.gmra.mrb[28].mxu0 %vm574_vm4, %v668_v58 }
 0x524   :  { %v1425_v60 = vpop.eup %1424  ;;  %1354 = vmatpush3.bf16.msra.mxu0 %v998_v59  ;;  %1355 = vmatprep.mubr.msk.bf16.mxu0 %vm1457_vm1, %v1455_v36 }
 0x525   :  { %v662_v61 = vmul.f32 %v1425_v60, %v1630_v18 }
 0x527   :  { %v670_v62 = vpack.c.bf16 %v662_v61, %v662_v61 }
 0x52b   :  { %1356 = vmatmul.mubr.msk.bf16.vlgmr.msra.gmra.mrb[32].mxu0 %vm574_vm4, %v670_v62 }
 0x53c   :  { %v637_v63 = vpop.xlane.xlu0 %636 }
 0x53d   :  { %1426 = vrcp.f32 %v637_v63 }
 0x540   :  { %v643_v0 = vpop.xlane.xlu0 %642 }
 0x541   :  { %1428 = vrcp.f32 %v643_v0 }
 0x544   :  { %v174_v3 = vpop.permute.xlu0 %173 }
 0x545   :  { %v952_v6 = vsel %vm674_vm3, %v174_v3, 0 }
 0x547   :  { %v1427_v1 = vpop.eup %1426 }
 0x548   :  { %v659_v2 = vmul.f32 %v1427_v1, %v1641_v32 }
 0x54a   :  { %v667_v4 = vpack.c.bf16 %v659_v2, %v659_v2 }
 0x54b   :  { %v1429_v5 = vpop.eup %1428 }
 0x54c   :  { %1338 = vmatmul.mubr.msk.bf16.vlgmr.msra.gmra.mrb[24].mxu1 %vm574_vm4, %v667_v4  ;;  %v661_v9 = vmul.f32 %v1429_v5, %v1645_v31 }
 0x54d   :  { %1348 = vmatpush3.bf16.msra.mxu1 %v952_v6  ;;  %1349 = vmatprep.mubr.msk.bf16.mxu1 %vm1457_vm1, %v1455_v36 }
 0x54e   :  { %1359 = vmatprep.subr.bf16.mxu1 %v1455_v36  ;;  %v669_v10 = vpack.c.bf16 %v661_v9, %v661_v9 }
 0x554   :  { %1350 = vmatmul.mubr.msk.bf16.vlgmr.msra.gmra.mrb[28].mxu1 %vm574_vm4, %v669_v10 }
 0x555   :  { %1367 = vmatprep.mubr.msk.bf16.mxu1 %vm1457_vm1, %v1455_v36  ;;  %1360 = vmatpush3.bf16.msra.mxu1 %v1390_v20 }
 0x556   :  { %1361 = vmatprep.subr.bf16.mxu1 %v1455_v36 }
 0x559   :  { %1362 = vmatpush3.bf16.msra.mxu1 %v1391_v21 }
 0x55a   :  { %1363 = vmatprep.subr.bf16.mxu1 %v1455_v36 }
 0x55d   :  { %1364 = vmatpush3.bf16.msra.mxu1 %v1392_v39 }
 0x55e   :  { %1365 = vmatprep.subr.bf16.mxu1 %v1455_v36 }
 0x561   :  { %1366 = vmatpush3.bf16.msra.mxu1 %v1393_v40 }
 0x57d   :  { %v712_v11 = vpop.f32.mrb[16].mxu1 }
 0x57e   :  { %v1315_v12 = vpop.f32.mrb[17].mxu1 }
 0x57f   :  { %v715_v13 = vpop.f32.mrb[18].mxu1 }
 0x580   :  { %v1316_v14 = vpop.f32.mrb[19].mxu1 }
 0x587   :  { %v758_v15 = vpop.f32.mrb[20].mxu0 }
 0x588   :  { %v1222_v16 = vpack.c.bf16 %v758_v15, %v712_v11  ;;  %v1321_v17 = vpop.f32.mrb[21].mxu0 }
 0x589   :  { %v761_v18 = vpop.f32.mrb[22].mxu0 }
 0x58a   :  { %v1322_v19 = vpop.f32.mrb[23].mxu0 }
 0x5ea   :  { %v804_v22 = vpop.f32.mrb[20].mxu1 }
 0x5eb   :  { %v1327_v23 = vpop.f32.mrb[21].mxu1 }
 0x5ec   :  { %v807_v24 = vpop.f32.mrb[22].mxu1 }
 0x5ed   :  { %v1328_v25 = vpop.f32.mrb[23].mxu1 }
 0x5ee   :  { %v850_v26 = vpop.f32.mrb[24].mxu0 }
 0x5ef   :  { %v1223_v27 = vpack.c.bf16 %v850_v26, %v804_v22  ;;  %v1333_v28 = vpop.f32.mrb[25].mxu0 }
 0x5f0   :  { %v853_v29 = vpop.f32.mrb[26].mxu0 }
 0x5f1   :  { %1058 = vrot.lane.b32.xlu0 %v1223_v27, %s1461_s13  ;;  %v1334_v30 = vpop.f32.mrb[27].mxu0 }
 0x5f6   :  { %v942_v32 = vpop.f32.mrb[28].mxu0 }
 0x5f7   :  { %v1345_v31 = vpop.f32.mrb[29].mxu0 }
 0x5f8   :  { %v945_v8 = vpop.f32.mrb[30].mxu0 }
 0x5f9   :  { %v1346_v33 = vpop.f32.mrb[31].mxu0 }
 0x5fe   :  { %v1034_v34 = vpop.f32.mrb[32].mxu0 }
 0x5ff   :  { %v1357_v35 = vpop.f32.mrb[33].mxu0 }
 0x600   :  { %v1037_v37 = vpop.f32.mrb[34].mxu0 }
 0x601   :  { %v1358_v38 = vpop.f32.mrb[35].mxu0 }
 0x61f   :  { %v896_v41 = vpop.f32.mrb[24].mxu1 }
 0x620   :  { %v1224_v42 = vpack.c.bf16 %v942_v32, %v896_v41  ;;  %v1339_v43 = vpop.f32.mrb[25].mxu1 }
 0x621   :  { %v899_v44 = vpop.f32.mrb[26].mxu1 }
 0x622   :  { %v1340_v45 = vpop.f32.mrb[27].mxu1  ;;  %1065 = vrot.lane.b32.xlu1 %v1224_v42, %s1462_s18 }
 0x627   :  { %v988_v46 = vpop.f32.mrb[28].mxu1 }
 0x628   :  { %v1225_v47 = vpack.c.bf16 %v1034_v34, %v988_v46  ;;  %v1351_v48 = vpop.f32.mrb[29].mxu1 }
 0x629   :  { %v991_v49 = vpop.f32.mrb[30].mxu1 }
 0x62a   :  { %v1352_v50 = vpop.f32.mrb[31].mxu1  ;;  %1072 = vrot.lane.b32.xlu0 %v1225_v47, %s1463_s19 }
 0x663   :  { %v1059_v7 = vpop.permute.xlu0 %1058 }
 0x664   :  { %v1076_v36 = vsel %vm179_vm2, %v1222_v16, %v1059_v7 }
 0x694   :  { %v1066_v51 = vpop.permute.xlu1 %1065 }
 0x695   :  { %v1078_v52 = vsel %vm24_vm0, %v1076_v36, %v1066_v51 }
 0x69c   :  { %v1073_v53 = vpop.permute.xlu0 %1072 }
 0x69d   :  { %v1081_v54 = vsel %vm1079_vm5, %v1078_v52, %v1073_v53 }
 0x69e   :  { %1368 = vmatmul.mubr.msk.bf16.vlgmr.msra.gmra.mrb[32].mxu1 %vm1114_vm6, %v1081_v54 }
 0x771   :  { %v1151_v55 = vpop.f32.mrb[32].mxu1 }
 0x772   :  { %1158 = vst.msk [vmem:[#allocation2] sm:$0xff] %vm24_vm0, %v1151_v55  ;;  %v1369_v56 = vpop.f32.mrb[33].mxu1 }
 0x773   :  { %v1154_v57 = vpop.f32.mrb[34].mxu1 }
 0x774   :  { %1159 = vst.msk [vmem:[#allocation2 + $0x8] sm:$0xff] %vm24_vm0, %v1154_v57  ;;  %v1370_v58 = vpop.f32.mrb[35].mxu1 }
 0x775   :  { %1441 = shalt.err (!%p1438_p4)
}
 0x776   :  { %s1442_s23 = scalar_lea.hbm %s1725_s5, 256 }
 0x777   :  { %p1443_p5 = scmp.ne.s32.totalorder %s1725_s5, %s1442_s23  ;;  %p1446_p6 = scmp.lt.u32.totalorder %s1442_s23, %s1725_s5 }
 0x779   :  { %p1448_p7 = pnand %p1446_p6, %p1443_p5 }
 0x77b   :  { %1451 = shalt.err (!%p1448_p7)
}
 0x77c   :  { %s1465_s28 = smov 128   ;;  %s1466_s29 = smov 8  }
 0x77d   :  { %1171 = dma.vmem_to_hbm [thread:$0]  %s1166_s20, 256, %s1725_s5, [#allocation3], %s1465_s28, %s1465_s28, %s1466_s29  }
 0x77e   :  { %1452 = dma.done.wait [#allocation3], 256  }
 0x77f   :  { %1453 = vsyncadd [#allocation3], 4294967040 }
 0x780   :  { %1175 = vsyncpa [#allocation3], 1 }

</bundles_post_ra>
